<compile_context>
chip_gen: v5e
topology: v5e:2x2
jax: 0.10.0
libtpu: 0.0.40
codegen_flags: <defaults>
</compile_context>

<pallas_src>
import jax
import jax.numpy as jnp
from jax.experimental import pallas as pl
from jax.experimental.pallas import tpu as pltpu


def norm_col_init(key, shape, std=1.0):
    """JAX port of the torch norm_col_init: row-normalized gaussian * std."""
    x = jax.random.normal(key, shape, dtype=jnp.float32)
    x = x * (std / jnp.sqrt(jnp.sum(x ** 2, axis=1, keepdims=True)))
    return x


def linear_kernel(params_ref, x_ref, o_ref):
    # params_ref: SMEM (3,) = [w00, w01, bias]
    # x_ref:      VMEM (2, TB)   -- features on sublanes, batch on lanes
    # o_ref:      VMEM (1, TB)   -- lane-dense output row
    w0 = params_ref[0]
    w1 = params_ref[1]
    b = params_ref[2]
    o_ref[...] = (w0 * x_ref[0:1, :] + w1 * x_ref[1:2, :] + b).astype(o_ref.dtype)


def my_sub_model_forward(inputs, weight, bias, *, tb=512):
    """inputs: (B, 2) f32; weight: (1, 2) f32 (torch layout); bias: (1,) f32."""
    B, K = inputs.shape
    N = weight.shape[0]          # 1
    assert K == 2 and N == 1

    # Lane-major relayout: (B, K) -> (K, Bp), batch padded to a multiple of tb.
    n_blocks = pl.cdiv(B, tb)
    Bp = n_blocks * tb
    x_t = jnp.transpose(inputs)                       # (K, B)
    x_t = jnp.pad(x_t, ((0, 0), (0, Bp - B)))         # (K, Bp)

    # Pack the two weights + bias as SMEM scalars.
    params = jnp.concatenate(
        [weight.reshape(-1), bias.reshape(-1)]).astype(jnp.float32)   # (3,)

    out_t = pl.pallas_call(
        linear_kernel,
        out_shape=jax.ShapeDtypeStruct((N, Bp), inputs.dtype),
        grid=(n_blocks,),
        in_specs=[
            pl.BlockSpec(memory_space=pltpu.MemorySpace.SMEM),   # params, whole
            pl.BlockSpec((K, tb), lambda i: (0, i)),             # x tile
        ],
        out_specs=pl.BlockSpec((N, tb), lambda i: (0, i)),
        compiler_params=pltpu.CompilerParams(
            dimension_semantics=("parallel",),
        ),
    )(params, x_t)

    # Back to torch layout: (N, Bp) -> (B, N).
    return out_t[:, :B].T


if __name__ == "__main__":
    key = jax.random.PRNGKey(0)
    k_w, k_x = jax.random.split(key)

    # Parameters (deterministic, mirrors MySubModel.__init__):
    #   fc = nn.Linear(2, 1); weight <- norm_col_init(std=0.01); bias <- 0
    weight = norm_col_init(k_w, (1, 2), std=0.01)   # (out_features, in_features)
    bias = jnp.zeros((1,), dtype=jnp.float32)

    # Small example batch consistent with the forward: (batch=8, features=2)
    x = jax.random.normal(k_x, (8, 2), dtype=jnp.float32)

    out = my_sub_model_forward(x, weight, bias)
    out = jax.block_until_ready(out)

    # Reference check (plain JAX) for correctness.
    ref = x @ weight.T + bias
    assert out.shape == (8, 1)
    assert jnp.allclose(out, ref, atol=1e-5, rtol=1e-5)

    print("KERNEL_OK")
</pallas_src>

<mosaic_0001>
module attributes {stable_mosaic.version = 11 : i64} {
  func.func @linear_kernel(%arg0: i32, %arg1: memref<3xf32, #tpu.memory_space<smem>>, %arg2: memref<2x512xf32, #tpu.memory_space<vmem>>, %arg3: memref<1x512xf32, #tpu.memory_space<vmem>>) attributes {dimension_semantics = [#tpu.dimension_semantics<parallel>], iteration_bounds = array<i64: 1>, scalar_prefetch = 0 : i64, scratch_operands = 0 : i64, tpu.core_type = #tpu.core_type<tc>, window_params = [{transform_indices = @transform_0, window_bounds = array<i64: 3>}, {transform_indices = @transform_1, window_bounds = array<i64: 2, 512>}, {transform_indices = @transform_2, window_bounds = array<i64: 1, 512>}]} {
    %c0 = arith.constant 0 : index
    %0 = memref.load %arg1[%c0] : memref<3xf32, #tpu.memory_space<smem>>
    %c1 = arith.constant 1 : index
    %1 = memref.load %arg1[%c1] : memref<3xf32, #tpu.memory_space<smem>>
    %c2 = arith.constant 2 : index
    %2 = memref.load %arg1[%c2] : memref<3xf32, #tpu.memory_space<smem>>
    %c0_0 = arith.constant 0 : index
    %c0_1 = arith.constant 0 : index
    %3 = vector.load %arg2[%c0_0, %c0_1] : memref<2x512xf32, #tpu.memory_space<vmem>>, vector<1x512xf32>
    %4 = vector.broadcast %0 : f32 to vector<1x512xf32>
    %5 = arith.mulf %4, %3 : vector<1x512xf32>
    %c1_2 = arith.constant 1 : index
    %c0_3 = arith.constant 0 : index
    %6 = vector.load %arg2[%c1_2, %c0_3] : memref<2x512xf32, #tpu.memory_space<vmem>>, vector<1x512xf32>
    %7 = vector.broadcast %1 : f32 to vector<1x512xf32>
    %8 = arith.mulf %7, %6 : vector<1x512xf32>
    %9 = arith.addf %5, %8 : vector<1x512xf32>
    %10 = vector.broadcast %2 : f32 to vector<1x512xf32>
    %11 = arith.addf %9, %10 : vector<1x512xf32>
    %c0_4 = arith.constant 0 : index
    %c0_5 = arith.constant 0 : index
    %12 = vector.load %arg3[%c0_4, %c0_5] : memref<1x512xf32, #tpu.memory_space<vmem>>, vector<1x512xf32>
    tpu.vector_store %arg3[%c0_4, %c0_5], %11 {strides = array<i32>} : memref<1x512xf32, #tpu.memory_space<vmem>>, vector<1x512xf32>,
    return
  }
  func.func @transform_0(%arg0: i32) -> i32 {
    %c0_i32 = arith.constant 0 : i32
    %c0_i32_0 = arith.constant 0 : i32
    return %c0_i32 : i32
  }
  func.func @transform_1(%arg0: i32) -> (i32, i32) {
    %c0_i32 = arith.constant 0 : i32
    %c0_i32_0 = arith.constant 0 : i32
    return %c0_i32, %arg0 : i32, i32
  }
  func.func @transform_2(%arg0: i32) -> (i32, i32) {
    %c0_i32 = arith.constant 0 : i32
    %c0_i32_0 = arith.constant 0 : i32
    return %c0_i32, %arg0 : i32, i32
  }
}

</mosaic_0001>

<bundles_post_ra>
// kernel: tpu_custom_call.1
= control target key start
LH: loop header
LB: loop body
LE: loop exit
PB: predicated region body
PF: predicated region fallthrough
CT: control target
= control target key end

     0   :  { %7 = vsyncpa [#allocation5], 0  ;;  %s173_s0 = inlined_call_operand.hbm [shape: f32[3], index: 0, kind: input, shape index: {}]   ;;  %s174_s1 = inlined_call_operand.hbm [shape: f32[2,512], index: 1, kind: input, shape index: {}]   ;;  %s175_s2 = inlined_call_operand.hbm [shape: f32[1,512], index: 2, kind: output, shape index: {}]  }
   0x1   :  { %8 = vsyncpa [#allocation3], 0 }
   0x2   :  { %9 = vsyncpa [#allocation4], 0  ;;  %s15_s11 = sshll.u32 %s173_s0, 4  ;;  %s24_s14 = sshll.u32 %s174_s1, 4  ;;  %s16_s11 = int_to_ptr.hbm [resolvable:$true] %s15_s11  ;;  %s25_s14 = int_to_ptr.hbm [resolvable:$true] %s24_s14 }
   0x3   :  { %s146_s15 = smov [#allocation2]   ;;  %s147_s16 = smov [#allocation6]  }
   0x4   :  { %18 = dma.hbm_to_smem %s16_s11, 16, %s146_s15, [#allocation5]  }
   0x5   :  { %s26_s17 = sshll.u32 %s147_s16, 4  ;;  %s27_s17 = int_to_ptr.vmem [resolvable:$true] %s26_s17 }
   0x6   :  { %29 = dma.hbm_to_vmem [thread:$0]  %s25_s14, 128, %s27_s17, [#allocation3]  }
   0x7   :  { %140 = dma.done.wait [#allocation5], 16  }
   0x8   :  { %141 = vsyncadd [#allocation5], 4294967280 }
   0x9   :  { %142 = dma.done.wait [#allocation3], 128  }
   0xa   :  { %143 = vsyncadd [#allocation3], 4294967168 }
   0xb   :  { %38 = sfence }
   0xc   :  { %s39_s18 = sld [smem:[#allocation2]]  ;;  %v42_v0 = vld [vmem:[#allocation6] ss:$2 sm:$0xf]  ;;  %v52_v5 = vlaneseq  ;;  %s148_s1 = smov [#allocation7]  }
   0xd   :  { %s75_s19 = sld [smem:[#allocation2 + $0x1]]  ;;  %v46_v1 = vld [vmem:[#allocation6 + $0x1] ss:$2 sm:$0xf]  ;;  %s62_s20 = sshll.u32 %s148_s1, 4  ;;  %s63_s20 = int_to_ptr.vmem [resolvable:$true] %s62_s20 }
   0xe   :  { %s76_s0 = sld [smem:[#allocation2 + $0x2]]  ;;  %s64_s23 = sshll.u32 %s175_s2, 4  ;;  %vm54_vm0 = vcmp.lt.s32.totalorder %v52_v5, 512  ;;  %s65_s23 = int_to_ptr.hbm [resolvable:$true] %s64_s23 }
  0x12   :  { %v43_v2 = vstv %s39_s18 }
  0x13   :  { %v44_v3 = vmul.f32 %v43_v2, %v42_v0  ;;  %v47_v4 = vstv %s75_s19 }
  0x14   :  { %v48_v6 = vmul.f32 %v47_v4, %v46_v1  ;;  %v50_v7 = vstv %s76_s0 }
  0x16   :  { %v49_v8 = vadd.f32 %v48_v6, %v44_v3 }
  0x18   :  { %v51_v9 = vadd.f32 %v50_v7, %v49_v8 }
  0x1a   :  { %56 = vst.msk [vmem:[#allocation7] sm:$0xf] %vm54_vm0, %v51_v9 }
  0x1b   :  { %67 = dma.vmem_to_hbm [thread:$0]  %s63_s20, 64, %s65_s23, [#allocation4]  }
  0x1c   :  { %144 = dma.done.wait [#allocation4], 64  }
  0x1d   :  { %145 = vsyncadd [#allocation4], 4294967232 }
  0x1e   :  { %72 = vsyncpa [#allocation3], 1 }
  0x1f   :  { %73 = vsyncpa [#allocation4], 1 }
  0x20   :  { %74 = vsyncpa [#allocation5], 1 }

</bundles_post_ra>
